<compile_context>
chip_gen: v7x
topology: tpu7x:2x2x1
jax: 0.10.0
libtpu: 0.0.40
codegen_flags: <defaults>
</compile_context>

<pallas_src>
from typing import Dict, List

import numpy as np
import jax
import jax.numpy as jnp
from jax import lax
from jax.experimental import pallas as pl
from jax.experimental.pallas import tpu as pltpu


# ----------------------------------------------------------------------------
# Pallas kernel
# ----------------------------------------------------------------------------
def _make_kernel(cut2_list, tile, use_mxu):
    ncut = len(cut2_list)

    def kernel(bi_tab, bj_tab, tmin, tmax,                 # SMEM prefetch
               pos_ref, posT_ref, sysr_ref, sysc_ref, sqr_ref, sqc_ref,
               mask_ref):
        t = pl.program_id(0)
        bi = bi_tab[t]
        bj = bj_tab[t]

        # tile-level same-system pruning: row-tile sys range vs col-tile range
        overlap = jnp.logical_and(tmin[bi] <= tmax[bj], tmin[bj] <= tmax[bi])

        @pl.when(jnp.logical_not(overlap))
        def _():
            mask_ref[...] = jnp.zeros_like(mask_ref)

        @pl.when(overlap)
        def _():
            if use_mxu:
                # Gram identity: cross term on the MXU (idle otherwise);
                # padded coordinate lanes are zero -> no contribution.
                cross = jnp.dot(pos_ref[...], posT_ref[...],
                                preferred_element_type=jnp.float32)
                d2 = (sqr_ref[...] + sqc_ref[...]) - 2.0 * cross
            else:
                # exact per-coordinate path (no cancellation near the cutoff)
                diff = pos_ref[:, 0:1] - posT_ref[0:1, :]
                d2 = diff * diff
                for c in (1, 2):
                    diff = pos_ref[:, c:c + 1] - posT_ref[c:c + 1, :]
                    d2 = d2 + diff * diff

            # raw cutoff bits; validity masking is hoisted out of this loop
            bits = (d2 < cut2_list[0]).astype(jnp.int32)
            for ic in range(1, ncut):
                bits = bits | ((d2 < cut2_list[ic]).astype(jnp.int32)
                               * (1 << ic))

            same = sysr_ref[...] == sysc_ref[...]          # (tile, tile)

            @pl.when(bi == bj)
            def _():
                # diagonal tile: triangular mask with LOCAL iotas
                # (the +bi*tile / +bj*tile offsets cancel on the diagonal)
                row = lax.broadcasted_iota(jnp.int32, (tile, tile), 0)
                col = lax.broadcasted_iota(jnp.int32, (tile, tile), 1)
                keep = jnp.logical_and(same, row < col)
                mask_ref[0] = jnp.where(keep, bits, 0).astype(jnp.int8)

            @pl.when(bi != bj)
            def _():
                # strictly-above-diagonal tile: i<j always holds -> no iota
                mask_ref[0] = jnp.where(same, bits, 0).astype(jnp.int8)

    return kernel


def pair_masks(prep, cut2_list, use_mxu=True):
    """Run the Pallas kernel.

    Returns a packed (n_upper_tiles, tile, tile) int8 cutoff-bitmask, one slab
    per upper-triangular (row-tile, col-tile) pair (tables in `prep`).
    """
    tile = prep['tile']
    nut = int(prep['bi_tab_np'].shape[0])
    ncut = len(cut2_list)
    assert ncut <= 8, "int8 bitmask supports at most 8 cutoffs"

    kernel = _make_kernel(tuple(float(c) for c in cut2_list), tile, use_mxu)

    grid_spec = pltpu.PrefetchScalarGridSpec(
        num_scalar_prefetch=4,
        grid=(nut,),
        in_specs=[
            pl.BlockSpec((tile, 8), lambda t, bt, ct, mn, mx: (bt[t], 0)),
            pl.BlockSpec((8, tile), lambda t, bt, ct, mn, mx: (0, ct[t])),
            pl.BlockSpec((tile, 1), lambda t, bt, ct, mn, mx: (bt[t], 0)),
            pl.BlockSpec((1, tile), lambda t, bt, ct, mn, mx: (0, ct[t])),
            pl.BlockSpec((tile, 1), lambda t, bt, ct, mn, mx: (bt[t], 0)),
            pl.BlockSpec((1, tile), lambda t, bt, ct, mn, mx: (0, ct[t])),
        ],
        out_specs=pl.BlockSpec((1, tile, tile),
                               lambda t, bt, ct, mn, mx: (t, 0, 0)),
    )
    return pl.pallas_call(
        kernel,
        out_shape=jax.ShapeDtypeStruct((nut, tile, tile), jnp.int8),
        grid_spec=grid_spec,
        compiler_params=pltpu.CompilerParams(
            dimension_semantics=("parallel",),
            vmem_limit_bytes=48 * 1024 * 1024),
    )(prep['bi_tab'], prep['bj_tab'], prep['tmin'], prep['tmax'],
      prep['pos'], prep['posT'], prep['sys_row'], prep['sys_col'],
      prep['sq_row'], prep['sq_col'])


# ----------------------------------------------------------------------------
# Padding / table-building glue
# ----------------------------------------------------------------------------
def _pad_inputs(positions_np, sys_np, tile=None):
    n = positions_np.shape[0]
    npad = max(128, int(np.ceil(n / 128.0)) * 128)
    if tile is None:
        tile = 128
        for t in (1024, 512, 256, 128):     # biggest tile that divides npad
            if npad % t == 0:
                tile = t
                break
    assert npad % tile == 0

    pos_pad = np.zeros((npad, 8), np.float32)
    pos_pad[:n, :3] = positions_np.astype(np.float32)

    # pad atoms keep zero coordinates; their distinct negative sys ids make
    # the same-system mask exclude them and all-pad tiles get range-pruned.
    sys_pad = np.empty((npad,), np.int32)
    sys_pad[:n] = sys_np.astype(np.int32)
    sys_pad[n:] = -(np.arange(n, npad, dtype=np.int32) + 1)

    sq = (pos_pad[:, :3].astype(np.float32) ** 2).sum(axis=1).astype(np.float32)

    ntile = npad // tile
    tmin = sys_pad.reshape(ntile, tile).min(axis=1).astype(np.int32)
    tmax = sys_pad.reshape(ntile, tile).max(axis=1).astype(np.int32)

    bi_list, bj_list = [], []
    for bi in range(ntile):
        for bj in range(bi, ntile):
            bi_list.append(bi)
            bj_list.append(bj)
    bi_tab = np.asarray(bi_list, np.int32)
    bj_tab = np.asarray(bj_list, np.int32)

    return dict(
        pos=jnp.asarray(pos_pad),
        posT=jnp.asarray(np.ascontiguousarray(pos_pad.T)),       # (8, NPAD)
        sys_row=jnp.asarray(sys_pad.reshape(npad, 1)),
        sys_col=jnp.asarray(sys_pad.reshape(1, npad)),
        sq_row=jnp.asarray(sq.reshape(npad, 1)),
        sq_col=jnp.asarray(sq.reshape(1, npad)),
        bi_tab=jnp.asarray(bi_tab),
        bj_tab=jnp.asarray(bj_tab),
        tmin=jnp.asarray(tmin),
        tmax=jnp.asarray(tmax),
        bi_tab_np=bi_tab,
        bj_tab_np=bj_tab,
        tile=tile,
        npad=npad,
    )


def decode_pairs(masks_u8, bi_tab_np, bj_tab_np, tile, ncut):
    """Per-cutoff global upper-triangular (i, j) pair lists from packed tiles."""
    gi_all: List[List[np.ndarray]] = [[] for _ in range(ncut)]
    gj_all: List[List[np.ndarray]] = [[] for _ in range(ncut)]
    for t in range(masks_u8.shape[0]):
        slab = masks_u8[t]
        li, lj = np.nonzero(slab)
        if li.size == 0:
            continue
        vals = slab[li, lj]
        gi = li.astype(np.int64) + int(bi_tab_np[t]) * tile
        gj = lj.astype(np.int64) + int(bj_tab_np[t]) * tile
        for ic in range(ncut):
            m = ((vals >> ic) & 1).astype(bool)
            if m.any():
                gi_all[ic].append(gi[m])
                gj_all[ic].append(gj[m])
    empty = np.zeros((0,), np.int64)
    gi_cat = [np.concatenate(x) if len(x) else empty for x in gi_all]
    gj_cat = [np.concatenate(x) if len(x) else empty for x in gj_all]
    return gi_cat, gj_cat


def unpack_dense(masks_u8, bi_tab_np, bj_tab_np, tile, npad):
    """Testing helper: rebuild the dense (NPAD, NPAD) upper-tri bitmask."""
    dense = np.zeros((npad, npad), np.uint8)
    for t in range(masks_u8.shape[0]):
        bi = int(bi_tab_np[t])
        bj = int(bj_tab_np[t])
        dense[bi * tile:(bi + 1) * tile, bj * tile:(bj + 1) * tile] = masks_u8[t]
    return dense


# ----------------------------------------------------------------------------
# Module (JAX / numpy re-implementation of the torch module's forward)
# ----------------------------------------------------------------------------
class NeighborListRangeSeparatedFragments:
    def __init__(self, cutoff, use_mxu=True):
        self.cutoff = np.atleast_1d(np.asarray(cutoff, dtype=np.float32))
        self.max_cutoff = float(self.cutoff.max())
        self.use_mxu = use_mxu

    def __call__(self, coll_batch: Dict[str, jnp.ndarray],
                 atomic_numbers_cumsum=None) -> Dict[str, jnp.ndarray]:
        atomic_numbers = np.asarray(coll_batch['atomic_numbers'])
        positions = np.asarray(coll_batch['positions'], dtype=np.float32)
        pbc = np.asarray(coll_batch['pbc'])
        atoms_number = np.asarray(coll_batch['atoms_number'])

        sys_i = coll_batch.get('sys_i')
        sys_i = (np.zeros_like(atomic_numbers) if sys_i is None
                 else np.asarray(sys_i))
        fragments = coll_batch.get('fragments')
        fragments = (np.zeros_like(atomic_numbers) if fragments is None
                     else np.asarray(fragments))

        if atoms_number.ndim:
            if atomic_numbers_cumsum is None:
                atomic_numbers_cumsum = np.concatenate(
                    [np.zeros((1,), dtype=sys_i.dtype),
                     np.cumsum(atoms_number[:-1], axis=0)], axis=0)
        else:
            atomic_numbers_cumsum = np.zeros((1,), dtype=sys_i.dtype)
            sys_i = np.zeros_like(atomic_numbers)
            pbc = pbc[None, ...]
        atomic_numbers_cumsum = np.asarray(atomic_numbers_cumsum)

        # TODO(synk): PBC image shifts (_get_shifts + cartesian_prod over
        # images) are data-dependent-shape host logic with no clean Pallas
        # equivalent; only the non-periodic (pbc == False) path is supported.
        if np.any(pbc):
            raise NotImplementedError("PBC shifts not implemented in the "
                                      "Pallas version")

        # The host glue (like the torch reference's cumsum offsets) assumes
        # each system's atoms form one contiguous block in sys_i order.
        if sys_i.size > 1 and np.any(np.diff(sys_i.astype(np.int64)) < 0):
            raise NotImplementedError(
                "sys_i must be block-contiguous per system")

        # ---- hot path: packed pair bitmask from the Pallas kernel ----------
        prep = _pad_inputs(positions, sys_i)
        cut2 = (self.cutoff ** 2).tolist()
        ncut = len(cut2)
        masks = pair_masks(prep, cut2, use_mxu=self.use_mxu)
        # int8 -> uint8 view so bit 7 (8th cutoff) stays positive on the host
        masks_u8 = np.asarray(jax.block_until_ready(masks)).view(np.uint8)

        gi_cat, gj_cat = decode_pairs(masks_u8, prep['bi_tab_np'],
                                      prep['bj_tab_np'], prep['tile'], ncut)

        # ---- dynamic-shape glue (per-segment / bidirectional / sort) -------
        idcs_i: List[List[np.ndarray]] = [[] for _ in range(ncut)]
        idcs_j: List[List[np.ndarray]] = [[] for _ in range(ncut)]
        offsets: List[List[np.ndarray]] = [[] for _ in range(ncut)]
        for iseg, idx_off in enumerate(atomic_numbers_cumsum):
            off = int(idx_off)
            nseg = int(np.sum(sys_i == iseg))
            for ic in range(ncut):
                gi = gi_cat[ic]
                gj = gj_cat[ic]
                sel = (gi >= off) & (gi < off + nseg)
                li = gi[sel] - off
                lj = gj[sel] - off
                # restore torch.combinations (row-major) order, then
                # bidirectionalise + stable sort by idx_i (reference order)
                order0 = np.lexsort((lj, li))
                li = li[order0]
                lj = lj[order0]
                bi_i = np.concatenate([li, lj])
                bi_j = np.concatenate([lj, li])
                order = np.argsort(bi_i, kind='stable')
                idcs_i[ic].append((bi_i[order] + off).astype(atomic_numbers.dtype))
                idcs_j[ic].append((bi_j[order] + off).astype(atomic_numbers.dtype))
                offsets[ic].append(np.zeros((bi_i.shape[0], 3), np.float32))

        idcs_i = [np.concatenate(x, axis=0).astype(atomic_numbers.dtype)
                  for x in idcs_i]
        idcs_j = [np.concatenate(x, axis=0).astype(atomic_numbers.dtype)
                  for x in idcs_j]
        offsets = [np.concatenate(x, axis=0).astype(np.float32)
                   for x in offsets]
        fidcs_i = [fragments[x].astype(fragments.dtype) for x in idcs_i]

        coll_batch['idx_i'] = jnp.asarray(idcs_i[0])
        coll_batch['idx_j'] = jnp.asarray(idcs_j[0])
        coll_batch['pbc_offset_ij'] = jnp.asarray(offsets[0])
        coll_batch['fidx_i'] = jnp.asarray(fidcs_i[0])
        if len(idcs_i) > 1:
            coll_batch['idx_u'] = jnp.asarray(idcs_i[1])
            coll_batch['idx_v'] = jnp.asarray(idcs_j[1])
            coll_batch['pbc_offset_uv'] = jnp.asarray(offsets[1])
            coll_batch['fidx_u'] = jnp.asarray(fidcs_i[1])
        if len(idcs_i) > 2:
            coll_batch['idcs_k'] = [jnp.asarray(x) for x in idcs_i[2:]]
            coll_batch['idcs_l'] = [jnp.asarray(x) for x in idcs_j[2:]]
            coll_batch['pbc_offsets_l'] = [jnp.asarray(x) for x in offsets[2:]]
            coll_batch['fidx_k'] = [jnp.asarray(x) for x in fidcs_i[2:]]
        return coll_batch


# ----------------------------------------------------------------------------
# Example run + reference checks
# ----------------------------------------------------------------------------
if __name__ == "__main__":
    key = jax.random.PRNGKey(0)
    k1, k2, k3, k4 = jax.random.split(key, 4)
    cutoffs = [2.0, 4.0]

    # ---- kernel-level check: multi-tile, exercises diagonal, off-diagonal
    # and range-pruned tile branches, both distance paths -------------------
    atoms_number_big = np.array([100, 156, 128], dtype=np.int32)   # N = 384
    Nb = int(atoms_number_big.sum())
    pos_big = jax.random.uniform(k4, (Nb, 3), dtype=jnp.float32,
                                 minval=0.0, maxval=6.0)
    sys_big = np.repeat(np.arange(3, dtype=np.int32), atoms_number_big)

    pos_np = np.asarray(pos_big, dtype=np.float32)
    prep_big = _pad_inputs(pos_np, sys_big)
    pos64 = pos_np.astype(np.float64)
    d2_ref = ((pos64[:, None, :] - pos64[None, :, :]) ** 2).sum(-1)
    same_ref = sys_big[:, None] == sys_big[None, :]
    upper_ref = np.arange(Nb)[:, None] < np.arange(Nb)[None, :]

    for use_mxu in (True, False):
        masks = pair_masks(prep_big, [c * c for c in cutoffs], use_mxu=use_mxu)
        masks_u8 = np.asarray(jax.block_until_ready(masks)).view(np.uint8)
        dense = unpack_dense(masks_u8, prep_big['bi_tab_np'],
                             prep_big['bj_tab_np'], prep_big['tile'],
                             prep_big['npad'])
        for ic, c in enumerate(cutoffs):
            expected = (d2_ref < c * c) & same_ref & upper_ref
            got = ((dense[:Nb, :Nb] >> ic) & 1).astype(bool)
            # exclude exact float boundary pairs (f32 / Gram rounding delta)
            far = np.abs(d2_ref - c * c) > 1e-3
            assert np.array_equal(got[far], expected[far]), (use_mxu, ic)
        # padded rows/cols must never produce pairs
        assert not np.any(dense[Nb:, :]) and not np.any(dense[:, Nb:])

    # ---- module end-to-end run (matches the torch forward semantics) ------
    atoms_number = np.array([6, 10], dtype=np.int32)
    N = int(atoms_number.sum())
    positions = jax.random.uniform(k1, (N, 3), dtype=jnp.float32,
                                   minval=0.0, maxval=5.0)
    atomic_numbers = jax.random.randint(k2, (N,), 1, 10, dtype=jnp.int32)
    fragments = jax.random.randint(k3, (N,), 0, 3, dtype=jnp.int32)
    sys_i = jnp.concatenate(
        [jnp.full((int(n),), i, dtype=jnp.int32)
         for i, n in enumerate(atoms_number)])
    cell = jnp.zeros((2, 3, 3), jnp.float32)
    pbc = jnp.zeros((2, 3), dtype=bool)

    coll_batch = {
        'atomic_numbers': atomic_numbers,
        'positions': positions,
        'cell': cell,
        'pbc': pbc,
        'sys_i': sys_i,
        'fragments': fragments,
        'atoms_number': jnp.asarray(atoms_number),
    }

    module = NeighborListRangeSeparatedFragments(cutoffs)
    out = module(coll_batch)
    for k in ('idx_i', 'idx_j', 'pbc_offset_ij', 'fidx_i',
              'idx_u', 'idx_v', 'pbc_offset_uv', 'fidx_u'):
        jax.block_until_ready(out[k])

    # numpy reference of the torch logic (non-PBC), compared as pair sets
    pos_np2 = np.asarray(positions, dtype=np.float32)
    pos64_2 = pos_np2.astype(np.float64)
    sys_np2 = np.asarray(sys_i)
    frag_np = np.asarray(fragments)
    cumsum = np.concatenate([[0], np.cumsum(atoms_number[:-1])])
    out_pairs = [(np.asarray(out['idx_i']), np.asarray(out['idx_j'])),
                 (np.asarray(out['idx_u']), np.asarray(out['idx_v']))]
    for ic, c in enumerate(cutoffs):
        ref_set = set()
        for iseg, off in enumerate(cumsum):
            gidx = np.nonzero(sys_np2 == iseg)[0]
            ii, jj = np.triu_indices(gidx.size, k=1)
            gi, gj = gidx[ii], gidx[jj]
            d2 = ((pos64_2[gi] - pos64_2[gj]) ** 2).sum(-1)
            for a, b in zip(gi[d2 < c * c].tolist(), gj[d2 < c * c].tolist()):
                ref_set.add((a, b))
                ref_set.add((b, a))
        oi, oj = out_pairs[ic]
        out_set = set(zip(oi.tolist(), oj.tolist()))
        assert len(out_set) == oi.shape[0]           # no duplicate pairs

        def near(i, j, c2=c * c):
            return abs(((pos64_2[i] - pos64_2[j]) ** 2).sum() - c2) <= 1e-3

        ref_f = {p for p in ref_set if not near(*p)}
        out_f = {p for p in out_set if not near(*p)}
        assert ref_f == out_f
        assert np.all(np.diff(oi) >= 0)              # sorted by idx_i

    assert np.array_equal(np.asarray(out['fidx_i']),
                          frag_np[np.asarray(out['idx_i'])])
    assert np.array_equal(np.asarray(out['fidx_u']),
                          frag_np[np.asarray(out['idx_u'])])
    assert np.asarray(out['pbc_offset_ij']).shape == (len(np.asarray(out['idx_i'])), 3)
    assert not np.any(np.asarray(out['pbc_offset_ij']))

    print("KERNEL_OK")
</pallas_src>

<mosaic_0001>
module attributes {stable_mosaic.version = 11 : i64} {
  func.func @kernel(%arg0: i32, %arg1: memref<6xi32, #tpu.memory_space<smem>>, %arg2: memref<6xi32, #tpu.memory_space<smem>>, %arg3: memref<3xi32, #tpu.memory_space<smem>>, %arg4: memref<3xi32, #tpu.memory_space<smem>>, %arg5: memref<128x8xf32, #tpu.memory_space<vmem>>, %arg6: memref<8x128xf32, #tpu.memory_space<vmem>>, %arg7: memref<128x1xi32, #tpu.memory_space<vmem>>, %arg8: memref<1x128xi32, #tpu.memory_space<vmem>>, %arg9: memref<128x1xf32, #tpu.memory_space<vmem>>, %arg10: memref<1x128xf32, #tpu.memory_space<vmem>>, %arg11: memref<1x128x128xi8, #tpu.memory_space<vmem>>) attributes {dimension_semantics = [#tpu.dimension_semantics<parallel>], iteration_bounds = array<i64: 6>, scalar_prefetch = 4 : i64, scratch_operands = 0 : i64, tpu.core_type = #tpu.core_type<tc>, window_params = [{transform_indices = @transform_0, window_bounds = array<i64: 128, 8>}, {transform_indices = @transform_1, window_bounds = array<i64: 8, 128>}, {transform_indices = @transform_2, window_bounds = array<i64: 128, 1>}, {transform_indices = @transform_3, window_bounds = array<i64: 1, 128>}, {transform_indices = @transform_4, window_bounds = array<i64: 128, 1>}, {transform_indices = @transform_5, window_bounds = array<i64: 1, 128>}, {transform_indices = @transform_6, window_bounds = array<i64: 1, 128, 128>}]} {
    %0 = arith.index_cast %arg0 : i32 to index
    %1 = memref.load %arg1[%0] : memref<6xi32, #tpu.memory_space<smem>>
    %2 = arith.index_cast %arg0 : i32 to index
    %3 = memref.load %arg2[%2] : memref<6xi32, #tpu.memory_space<smem>>
    %4 = arith.index_cast %1 : i32 to index
    %5 = memref.load %arg3[%4] : memref<3xi32, #tpu.memory_space<smem>>
    %6 = arith.index_cast %3 : i32 to index
    %7 = memref.load %arg4[%6] : memref<3xi32, #tpu.memory_space<smem>>
    %8 = arith.cmpi sle, %5, %7 : i32
    %9 = arith.index_cast %3 : i32 to index
    %10 = memref.load %arg3[%9] : memref<3xi32, #tpu.memory_space<smem>>
    %11 = arith.index_cast %1 : i32 to index
    %12 = memref.load %arg4[%11] : memref<3xi32, #tpu.memory_space<smem>>
    %13 = arith.cmpi sle, %10, %12 : i32
    %14 = arith.andi %8, %13 : i1
    %true = arith.constant true
    %15 = arith.xori %14, %true : i1
    %16 = arith.extui %15 : i1 to i32
    %c0_i32 = arith.constant 0 : i32
    %17 = arith.cmpi ne, %16, %c0_i32 : i32
    scf.if %17 {
      %c0_i8 = arith.constant 0 : i8
      %20 = vector.broadcast %c0_i8 : i8 to vector<1x128x128xi8>
      %c0 = arith.constant 0 : index
      %c0_1 = arith.constant 0 : index
      %c0_2 = arith.constant 0 : index
      %21 = vector.load %arg11[%c0, %c0_1, %c0_2] : memref<1x128x128xi8, #tpu.memory_space<vmem>>, vector<1x128x128xi8>
      tpu.vector_store %arg11[%c0, %c0_1, %c0_2], %20 {strides = array<i32>} : memref<1x128x128xi8, #tpu.memory_space<vmem>>, vector<1x128x128xi8>,
    } else {
    }
    %18 = arith.extui %14 : i1 to i32
    %c0_i32_0 = arith.constant 0 : i32
    %19 = arith.cmpi ne, %18, %c0_i32_0 : i32
    scf.if %19 {
      %c0 = arith.constant 0 : index
      %c0_1 = arith.constant 0 : index
      %20 = vector.load %arg5[%c0, %c0_1] : memref<128x8xf32, #tpu.memory_space<vmem>>, vector<128x8xf32>
      %c0_2 = arith.constant 0 : index
      %c0_3 = arith.constant 0 : index
      %21 = vector.load %arg6[%c0_2, %c0_3] : memref<8x128xf32, #tpu.memory_space<vmem>>, vector<8x128xf32>
      %cst = arith.constant dense<0.000000e+00> : vector<128x128xf32>
      %22 = tpu.matmul %20, %21, %cst {dimension_numbers = #tpu.dot_dimension_numbers<[1], [0], [0], [1], [0, 0, 1, 1], [], []>} : vector<128x8xf32>, vector<8x128xf32>, vector<128x128xf32> -> vector<128x128xf32>
      %c0_4 = arith.constant 0 : index
      %c0_5 = arith.constant 0 : index
      %23 = vector.load %arg9[%c0_4, %c0_5] : memref<128x1xf32, #tpu.memory_space<vmem>>, vector<128x1xf32>
      %c0_6 = arith.constant 0 : index
      %c0_7 = arith.constant 0 : index
      %24 = vector.load %arg10[%c0_6, %c0_7] : memref<1x128xf32, #tpu.memory_space<vmem>>, vector<1x128xf32>
      %25 = vector.broadcast %23 : vector<128x1xf32> to vector<128x128xf32>
      %26 = vector.broadcast %24 : vector<1x128xf32> to vector<128x128xf32>
      %27 = arith.addf %25, %26 : vector<128x128xf32>
      %cst_8 = arith.constant 2.000000e+00 : f32
      %28 = vector.broadcast %cst_8 : f32 to vector<128x128xf32>
      %29 = arith.mulf %28, %22 : vector<128x128xf32>
      %30 = arith.subf %27, %29 : vector<128x128xf32>
      %cst_9 = arith.constant 4.000000e+00 : f32
      %31 = vector.broadcast %cst_9 : f32 to vector<128x128xf32>
      %32 = arith.cmpf olt, %30, %31 : vector<128x128xf32>
      %33 = arith.extui %32 : vector<128x128xi1> to vector<128x128xi32>
      %cst_10 = arith.constant 1.600000e+01 : f32
      %34 = vector.broadcast %cst_10 : f32 to vector<128x128xf32>
      %35 = arith.cmpf olt, %30, %34 : vector<128x128xf32>
      %36 = arith.extui %35 : vector<128x128xi1> to vector<128x128xi32>
      %c2_i32 = arith.constant 2 : i32
      %37 = vector.broadcast %c2_i32 : i32 to vector<128x128xi32>
      %38 = arith.muli %36, %37 : vector<128x128xi32>
      %39 = arith.ori %33, %38 : vector<128x128xi32>
      %c0_11 = arith.constant 0 : index
      %c0_12 = arith.constant 0 : index
      %40 = vector.load %arg7[%c0_11, %c0_12] : memref<128x1xi32, #tpu.memory_space<vmem>>, vector<128x1xi32>
      %c0_13 = arith.constant 0 : index
      %c0_14 = arith.constant 0 : index
      %41 = vector.load %arg8[%c0_13, %c0_14] : memref<1x128xi32, #tpu.memory_space<vmem>>, vector<1x128xi32>
      %42 = vector.broadcast %40 : vector<128x1xi32> to vector<128x128xi32>
      %43 = vector.broadcast %41 : vector<1x128xi32> to vector<128x128xi32>
      %44 = arith.cmpi eq, %42, %43 : vector<128x128xi32>
      %45 = arith.cmpi eq, %1, %3 : i32
      %46 = arith.extui %45 : i1 to i32
      %c0_i32_15 = arith.constant 0 : i32
      %47 = arith.cmpi ne, %46, %c0_i32_15 : i32
      scf.if %47 {
        %51 = tpu.iota {dimensions = array<i32: 0>} : vector<128x128xi32>
        %52 = tpu.iota {dimensions = array<i32: 1>} : vector<128x128xi32>
        %53 = arith.cmpi slt, %51, %52 : vector<128x128xi32>
        %54 = arith.andi %44, %53 : vector<128x128xi1>
        %c0_i32_17 = arith.constant 0 : i32
        %55 = vector.broadcast %c0_i32_17 : i32 to vector<128x128xi32>
        %56 = arith.select %54, %39, %55 : vector<128x128xi1>, vector<128x128xi32>
        %57 = arith.trunci %56 : vector<128x128xi32> to vector<128x128xi8>
        %c0_18 = arith.constant 0 : index
        %c0_19 = arith.constant 0 : index
        %c0_20 = arith.constant 0 : index
        %58 = vector.load %arg11[%c0_18, %c0_19, %c0_20] : memref<1x128x128xi8, #tpu.memory_space<vmem>>, vector<1x128x128xi8>
        %59 = vector.shape_cast %58 : vector<1x128x128xi8> to vector<128x128xi8>
        %60 = vector.shape_cast %57 : vector<128x128xi8> to vector<1x128x128xi8>
        tpu.vector_store %arg11[%c0_18, %c0_19, %c0_20], %60 {strides = array<i32>} : memref<1x128x128xi8, #tpu.memory_space<vmem>>, vector<1x128x128xi8>,
      } else {
      }
      %48 = arith.cmpi ne, %1, %3 : i32
      %49 = arith.extui %48 : i1 to i32
      %c0_i32_16 = arith.constant 0 : i32
      %50 = arith.cmpi ne, %49, %c0_i32_16 : i32
      scf.if %50 {
        %c0_i32_17 = arith.constant 0 : i32
        %51 = vector.broadcast %c0_i32_17 : i32 to vector<128x128xi32>
        %52 = arith.select %44, %39, %51 : vector<128x128xi1>, vector<128x128xi32>
        %53 = arith.trunci %52 : vector<128x128xi32> to vector<128x128xi8>
        %c0_18 = arith.constant 0 : index
        %c0_19 = arith.constant 0 : index
        %c0_20 = arith.constant 0 : index
        %54 = vector.load %arg11[%c0_18, %c0_19, %c0_20] : memref<1x128x128xi8, #tpu.memory_space<vmem>>, vector<1x128x128xi8>
        %55 = vector.shape_cast %54 : vector<1x128x128xi8> to vector<128x128xi8>
        %56 = vector.shape_cast %53 : vector<128x128xi8> to vector<1x128x128xi8>
        tpu.vector_store %arg11[%c0_18, %c0_19, %c0_20], %56 {strides = array<i32>} : memref<1x128x128xi8, #tpu.memory_space<vmem>>, vector<1x128x128xi8>,
      } else {
      }
    } else {
    }
    return
  }
  func.func @transform_0(%arg0: i32, %arg1: memref<6xi32, #tpu.memory_space<smem>>, %arg2: memref<6xi32, #tpu.memory_space<smem>>, %arg3: memref<3xi32, #tpu.memory_space<smem>>, %arg4: memref<3xi32, #tpu.memory_space<smem>>) -> (i32, i32) {
    %0 = arith.index_cast %arg0 : i32 to index
    %1 = memref.load %arg1[%0] : memref<6xi32, #tpu.memory_space<smem>>
    %c0_i32 = arith.constant 0 : i32
    %c0_i32_0 = arith.constant 0 : i32
    return %1, %c0_i32 : i32, i32
  }
  func.func @transform_1(%arg0: i32, %arg1: memref<6xi32, #tpu.memory_space<smem>>, %arg2: memref<6xi32, #tpu.memory_space<smem>>, %arg3: memref<3xi32, #tpu.memory_space<smem>>, %arg4: memref<3xi32, #tpu.memory_space<smem>>) -> (i32, i32) {
    %0 = arith.index_cast %arg0 : i32 to index
    %1 = memref.load %arg2[%0] : memref<6xi32, #tpu.memory_space<smem>>
    %c0_i32 = arith.constant 0 : i32
    %c0_i32_0 = arith.constant 0 : i32
    return %c0_i32, %1 : i32, i32
  }
  func.func @transform_2(%arg0: i32, %arg1: memref<6xi32, #tpu.memory_space<smem>>, %arg2: memref<6xi32, #tpu.memory_space<smem>>, %arg3: memref<3xi32, #tpu.memory_space<smem>>, %arg4: memref<3xi32, #tpu.memory_space<smem>>) -> (i32, i32) {
    %0 = arith.index_cast %arg0 : i32 to index
    %1 = memref.load %arg1[%0] : memref<6xi32, #tpu.memory_space<smem>>
    %c0_i32 = arith.constant 0 : i32
    %c0_i32_0 = arith.constant 0 : i32
    return %1, %c0_i32 : i32, i32
  }
  func.func @transform_3(%arg0: i32, %arg1: memref<6xi32, #tpu.memory_space<smem>>, %arg2: memref<6xi32, #tpu.memory_space<smem>>, %arg3: memref<3xi32, #tpu.memory_space<smem>>, %arg4: memref<3xi32, #tpu.memory_space<smem>>) -> (i32, i32) {
    %0 = arith.index_cast %arg0 : i32 to index
    %1 = memref.load %arg2[%0] : memref<6xi32, #tpu.memory_space<smem>>
    %c0_i32 = arith.constant 0 : i32
    %c0_i32_0 = arith.constant 0 : i32
    return %c0_i32, %1 : i32, i32
  }
  func.func @transform_4(%arg0: i32, %arg1: memref<6xi32, #tpu.memory_space<smem>>, %arg2: memref<6xi32, #tpu.memory_space<smem>>, %arg3: memref<3xi32, #tpu.memory_space<smem>>, %arg4: memref<3xi32, #tpu.memory_space<smem>>) -> (i32, i32) {
    %0 = arith.index_cast %arg0 : i32 to index
    %1 = memref.load %arg1[%0] : memref<6xi32, #tpu.memory_space<smem>>
    %c0_i32 = arith.constant 0 : i32
    %c0_i32_0 = arith.constant 0 : i32
    return %1, %c0_i32 : i32, i32
  }
  func.func @transform_5(%arg0: i32, %arg1: memref<6xi32, #tpu.memory_space<smem>>, %arg2: memref<6xi32, #tpu.memory_space<smem>>, %arg3: memref<3xi32, #tpu.memory_space<smem>>, %arg4: memref<3xi32, #tpu.memory_space<smem>>) -> (i32, i32) {
    %0 = arith.index_cast %arg0 : i32 to index
    %1 = memref.load %arg2[%0] : memref<6xi32, #tpu.memory_space<smem>>
    %c0_i32 = arith.constant 0 : i32
    %c0_i32_0 = arith.constant 0 : i32
    return %c0_i32, %1 : i32, i32
  }
  func.func @transform_6(%arg0: i32, %arg1: memref<6xi32, #tpu.memory_space<smem>>, %arg2: memref<6xi32, #tpu.memory_space<smem>>, %arg3: memref<3xi32, #tpu.memory_space<smem>>, %arg4: memref<3xi32, #tpu.memory_space<smem>>) -> (i32, i32, i32) {
    %c0_i32 = arith.constant 0 : i32
    %c0_i32_0 = arith.constant 0 : i32
    %c0_i32_1 = arith.constant 0 : i32
    return %arg0, %c0_i32, %c0_i32_0 : i32, i32, i32
  }
}

</mosaic_0001>

<bundles_post_ra>
// kernel: tpu_custom_call.1
= control target key start
LH: loop header
LB: loop body
LE: loop exit
PB: predicated region body
PF: predicated region fallthrough
CT: control target
= control target key end

     0   :  { %s2113_s0 = inlined_call_operand.vmem [shape: s32[6], index: 0, kind: input, shape index: {}]   ;;  %s2114_s4 = inlined_call_operand.vmem [shape: f32[384,8], index: 4, kind: input, shape index: {}]   ;;  %s2115_s5 = inlined_call_operand.vmem [shape: f32[8,384], index: 5, kind: input, shape index: {}]   ;;  %s2116_s6 = inlined_call_operand.vmem [shape: s32[384,1], index: 6, kind: input, shape index: {}]   ;;  %s2117_s7 = inlined_call_operand.vmem [shape: s32[1,384], index: 7, kind: input, shape index: {}]   ;;  %s2118_s8 = inlined_call_operand.vmem [shape: f32[384,1], index: 8, kind: input, shape index: {}]   ;;  %s2119_s9 = inlined_call_operand.vmem [shape: f32[1,384], index: 9, kind: input, shape index: {}]   ;;  %s2120_s10 = inlined_call_operand.hbm [shape: s8[6,128,128], index: 10, kind: output, shape index: {}]   ;;  %s2121_s1 = inlined_call_operand.vmem [shape: s32[6], index: 1, kind: input, shape index: {}]   ;;  %s2122_s2 = inlined_call_operand.vmem [shape: s32[3], index: 2, kind: input, shape index: {}]   ;;  %s2123_s3 = inlined_call_operand.vmem [shape: s32[3], index: 3, kind: input, shape index: {}]  }
   0x1   :  { %2134 = sst [smem:[#allocation16_spill]] %s2114_s4  ;;  %s15_s15 = sshll.u32 %s2113_s0, 4  ;;  %s16_s15 = int_to_ptr.vmem [resolvable:$true] %s15_s15 }
   0x2   :  { %2135 = sst [smem:[#allocation17_spill]] %s2115_s5  ;;  %s19_s18 = sshll.u32 %s2121_s1, 4  ;;  %s20_s18 = int_to_ptr.vmem [resolvable:$true] %s19_s18 }
   0x3   :  { %s1353_s19 = scalar_lea.vmem %s16_s15, 16  ;;  %p1358_p1 = scmp.lt.s32.totalorder %s16_s15, %s16_s15 }
   0x4   :  { %p1354_p0 = scmp.ne.s32.totalorder %s16_s15, %s1353_s19  ;;  %p1359_p2 = scmp.lt.s32.totalorder %s1353_s19, %s1353_s19 }
   0x6   :  { %p1360_p3 = por %p1359_p2, %p1358_p1 }
   0x8   :  { %p1361_p4 = pnand %p1360_p3, %p1354_p0 }
   0xa   :  { %1364 = shalt.err (!%p1361_p4)  }
   0xb   :  { %s1467_s20 = smov [#allocation3]   ;;  %s1365_s21 = scalar_lea.vmem %s20_s18, 16 }
   0xc   :  { %18 = dma.vmem_to_smem %s16_s15, 16, %s1467_s20, [#allocation2] }
   0xd   :  { %p1366_p5 = scmp.ne.s32.totalorder %s20_s18, %s1365_s21  ;;  %p1370_p6 = scmp.lt.s32.totalorder %s20_s18, %s20_s18 }
   0xe   :  { %p1371_p7 = scmp.lt.s32.totalorder %s1365_s21, %s1365_s21 }
  0x10   :  { %p1372_p8 = por %p1371_p7, %p1370_p6 }
  0x12   :  { %p1373_p9 = pnand %p1372_p8, %p1366_p5 }
  0x14   :  { %1376 = shalt.err (!%p1373_p9)  }
  0x15   :  { %s1468_s0 = smov [#allocation4]   ;;  %s23_s23 = sshll.u32 %s2122_s2, 4  ;;  %s24_s23 = int_to_ptr.vmem [resolvable:$true] %s23_s23 }
  0x16   :  { %22 = dma.vmem_to_smem %s20_s18, 16, %s1468_s0, [#allocation2] }
  0x17   :  { %s27_s26 = sshll.u32 %s2123_s3, 4  ;;  %s1377_s27 = scalar_lea.vmem %s24_s23, 16  ;;  %s28_s26 = int_to_ptr.vmem [resolvable:$true] %s27_s26 }
  0x18   :  { %p1378_p10 = scmp.ne.s32.totalorder %s24_s23, %s1377_s27  ;;  %p1382_p11 = scmp.lt.s32.totalorder %s24_s23, %s24_s23 }
  0x19   :  { %p1383_p12 = scmp.lt.s32.totalorder %s1377_s27, %s1377_s27 }
  0x1b   :  { %p1384_p13 = por %p1383_p12, %p1382_p11 }
  0x1d   :  { %p1385_p0 = pnand %p1384_p13, %p1378_p10 }
  0x1f   :  { %1388 = shalt.err (!%p1385_p0)  }
  0x20   :  { %s1469_s28 = smov [#allocation5]   ;;  %s1389_s29 = scalar_lea.vmem %s28_s26, 16 }
  0x21   :  { %26 = dma.vmem_to_smem %s24_s23, 16, %s1469_s28, [#allocation2] }
  0x22   :  { %p1390_p1 = scmp.ne.s32.totalorder %s28_s26, %s1389_s29  ;;  %p1394_p2 = scmp.lt.s32.totalorder %s28_s26, %s28_s26 }
  0x23   :  { %p1395_p3 = scmp.lt.s32.totalorder %s1389_s29, %s1389_s29 }
  0x25   :  { %p1396_p4 = por %p1395_p3, %p1394_p2 }
  0x27   :  { %p1397_p5 = pnand %p1396_p4, %p1390_p1 }
  0x29   :  { %1400 = shalt.err (!%p1397_p5)  }
  0x2a   :  { %s1470_s2 = smov [#allocation6]  }
  0x2b   :  { %30 = dma.vmem_to_smem %s28_s26, 16, %s1470_s2, [#allocation2] }
  0x2c   :  { %1445 = dma.done.wait [#allocation2], 64 }
  0x2d   :  { %1446 = vsyncadd [#allocation2], 4294967232 }
  0x2e   :  { %32 = sfence }
  0x2f   :  { %33 = vsyncpa [#allocation8], 0 }
  0x30   :  { %35 = vsyncpa [#allocation8 + $0x1], 0  ;;  %s1543_s3 = smov 0   ;;  %s1545_s30 = smov 0  }
  0x31   :  { %s1547_s11 = smov 0   ;;  %s1549_s12 = smov 0  }
  0x32 LB: > { %2136 = sst [smem:[#allocation11_spill]] %s1453_s3  ;;  %s1564_s13 = sadd.s32 4294967295, %s1465_s12   ;;  %s1465_s12 = sphi %s1549_s12, %s2172_s12   ;;  %s1461_s11 = sphi %s1547_s11, %s2174_s11   ;;  %s1457_s30 = sphi %s1545_s30, %s2176_s30   ;;  %s1453_s3 = sphi %s1543_s3, %s2175_s3  }
  0x33   : > { %2137 = sst [smem:[#allocation12_spill]] %s1461_s11  ;;  %s1221_s14 = sadd.s32 4294967294, %s1465_s12  }
  0x34   : > { %s1568_s15 = sadd.s32 1, %s1465_s12   ;;  %s216_s16 = sadd.s32 1, %s1461_s11 }
  0x35   : > { %2138 = sst [smem:[#allocation13_spill]] %s1568_s15  ;;  %s213_s17 = ssub.s32 %s1465_s12, %s1568_s15 }
  0x36   : > { %p226_p6 = scmp.ne.s32.totalorder %s1461_s11, %s1457_s30  ;;  %p214_p7 = scmp.eq.s32.totalorder %s213_s17, 0 }
  0x37   : > { %p227_p8 = scmp.eq.s32.totalorder %s1564_s13, 5  ;;  %p232_p9 = scmp.ne.s32.totalorder %s1457_s30, %s1453_s3 }
  0x38   : > { %p233_p10 = scmp.eq.s32.totalorder %s1221_s14, 5  ;;  %p1224_p13 = scmp.ge.s32.totalorder %s1465_s12, 1 }
  0x39   : > { %s1579_s18 = scalar_select %p214_p7, %s1461_s11, %s216_s16  }
  0x3a   : > { %p1581_p11 = por %p227_p8, %p226_p6  ;;  %p1585_p12 = por %p233_p10, %p232_p9 }
  0x3b   : > { %2139 = sst [smem:[#allocation14_spill]] %s1579_s18  ;;  %p309_p0 = scmp.lt.s32.totalorder %s1465_s12, 7 }
  0x3c   : > { %s2141_s20 = scalar_select %p1585_p12, 1, 0 }
  0x3d   : > { %p310_p1 = pnand %p1224_p13, %p309_p0 }
  0x3e   : > { %2142 = sst [smem:[#allocation15_spill]] %s2141_s20  ;;  %s2124_s21 = sand.u32 (!%p310_p1), 1, %s1457_s30  }
  0x3f   : > { %313 = sbr.rel (%p310_p1) target bundleno = 419 (0x1a3), region = 44  ;;  %s365_s0 = sld [smem:[#allocation3 + %s1564_s13]] (!%p310_p1) }
  0x40   : > { %s1595_s1 = sshll.u32 (!%p310_p1), %s2124_s21, 5  ;;  %s373_s22 = sld [smem:[#allocation4 + %s1564_s13]] (!%p310_p1) }
  0x41   : > { %s379_s23 = sld [smem:[#allocation3 + %s1564_s13]] (!%p310_p1) }
  0x42   : > { %s387_s24 = sld [smem:[#allocation4 + %s1564_s13]] (!%p310_p1) }
  0x43   : > { %s392_s25 = sld [smem:[#allocation3 + %s1564_s13]] (!%p310_p1) }
  0x44   : > { %s400_s26 = sld [smem:[#allocation4 + %s1564_s13]] (!%p310_p1) }
  0x45   : > { %s1226_s27 = sshll.u32 (!%p310_p1), %s365_s0, 4  ;;  %s1603_s28 = sld [smem:[#allocation3 + %s1564_s13]] (!%p310_p1) }
  0x46   : > { %p367_p2 = scmp.lt.s32.totalorder %s1226_s27, 47  ;;  %p374_p3 = scmp.lt.s32.totalorder %s373_s22, 2 }
  0x47   : > { %s1229_s29 = sshll.u32 %s379_s23, 4  ;;  %s1606_s2 = sld [smem:[#allocation4 + %s1564_s13]] }
  0x48   : > { %s2178_s27 = smov (!%p367_p2, %s1226_s27), 47  ;;  %s2180_s22 = smov (!%p374_p3, %s373_s22), 2 }
  0x49   : > { %s1227_s14 = sshll.u32 %s2178_s27, 3  ;;  %p381_p4 = scmp.lt.s32.totalorder %s1229_s29, 47 }
  0x4a   : > { %s2143_s4 = sld [smem:[#allocation16_spill]]  ;;  %s1228_s18 = sshll.u32 %s2180_s22, 3 }
  0x4b   : > { %s2144_s5 = sld [smem:[#allocation17_spill]]  ;;  %p388_p5 = scmp.lt.s32.totalorder %s387_s24, 2 }
  0x4c   : > { %s2182_s29 = smov (!%p381_p4, %s1229_s29), 47  ;;  %s1231_s27 = sshll.u32 %s392_s25, 4 }
  0x4d   : > { %s2184_s24 = smov (!%p388_p5, %s387_s24), 2  ;;  %s1230_s23 = sshll.u32 %s2182_s29, 3 }
  0x4e   : > { %s1621_s16 = scalar_lea.vmem %s2116_s6, %s1230_s23  ;;  %p394_p6 = scmp.lt.s32.totalorder %s1231_s27, 47 }
  0x4f   : > { %p401_p7 = scmp.lt.s32.totalorder %s400_s26, 2  ;;  %s409_s17 = sld [smem:[#allocation6 + %s1606_s2]] }
  0x50   : > { %s1611_s21 = scalar_lea.vmem %s2143_s4, %s1227_s14  ;;  %s2186_s27 = smov (!%p394_p6, %s1231_s27), 47 }
  0x51   : > { %s377_s15 = scalar_lea.vmem %s2144_s5, %s1228_s18  ;;  %s408_s18 = sld [smem:[#allocation5 + %s1603_s28]] }
  0x52   : > { %s2188_s26 = smov (!%p401_p7, %s400_s26), 2  ;;  %s1232_s29 = sshll.u32 %s2186_s27, 3 }
  0x53   : > { %s411_s25 = sld [smem:[#allocation5 + %s1606_s2]]  ;;  %s1635_s3 = scalar_lea.vmem %s2118_s8, %s1232_s29 }
  0x54   : > { %s403_s14 = scalar_lea.vmem %s2119_s9, %s2188_s26  ;;  %s412_s22 = sld [smem:[#allocation6 + %s1603_s28]] }
  0x55   : > { %s1647_s5 = scalar_lea.vmem [#allocation7], %s1595_s1 }
  0x57   : > { %p410_p8 = scmp.le.s32.totalorder %s408_s18, %s409_s17 }
  0x5a   : > { %p413_p9 = scmp.le.s32.totalorder %s411_s25, %s412_s22 }
  0x5c   : > { %p1642_p10 = pnand %p413_p9, %p410_p8 }
  0x5d   : > { %v434_v0 = vld [vmem:[%s377_s15] sm:$0xff] (!%p1642_p10)  ;;  %v631_v1 = vld [vmem:[%s1635_s3 + $0x10] sm:$0xff] (!%p1642_p10)  ;;  %v1471_v3 = vmov (!%p1642_p10), 0   ;;  %vm435_vm0 = vcmask (!%p1642_p10), 64512   ;;  %v419_v6 = vld [vmem:[%s1611_s21 + $0x8] sm:$0xff] (!%p1642_p10)  ;;  %p1251_p13 = scmp.ne.s32.totalorder (!%p1642_p10), %s1603_s28, %s1606_s2 }
  0x5e   : > { %417 = sbr.rel (%p1642_p10) target bundleno = 386 (0x182), region = 48  ;;  %v629_v2 = vld [vmem:[%s1635_s3] sm:$0xff] (!%p1642_p10)  ;;  %1352 = vset.pattern.permute.xlu1 (!%p1642_p10), %v1471_v3  ;;  %1351 = vset.pattern.permute.xlu0 (!%p1642_p10), %v1471_v3  ;;  %v427_v7 = vld [vmem:[%s1611_s21 + $0x48] sm:$0xff] (!%p1642_p10)  ;;  %v632_v8 = vld [vmem:[%s1635_s3 + $0x18] sm:$0xff] (!%p1642_p10) }
  0x5f   : > { %1276 = vmatprep.subr.mxu0 (!%p1642_p10), %v434_v0  ;;  %1302 = vmatprep.subr.mxu1 (!%p1642_p10), %v434_v0  ;;  %v418_v4 = vld [vmem:[%s1611_s21] sm:$0xff] (!%p1642_p10)  ;;  %v630_v9 = vld [vmem:[%s1635_s3 + $0x8] sm:$0xff] (!%p1642_p10)  ;;  %v420_v10 = vld [vmem:[%s1611_s21 + $0x10] sm:$0xff] (!%p1642_p10) }
  0x60   : > { %v426_v5 = vld [vmem:[%s1611_s21 + $0x40] sm:$0xff] (!%p1642_p10)  ;;  %658 = vperm.xlu1 (!%p1642_p10), %1352, %v631_v1   ;;  %648 = vperm.xlu0 (!%p1642_p10), %1351, %v629_v2   ;;  %v428_v11 = vld [vmem:[%s1611_s21 + $0x50] sm:$0xff] (!%p1642_p10)  ;;  %v421_v12 = vld [vmem:[%s1611_s21 + $0x18] sm:$0xff] (!%p1642_p10) }
  0x61   : > { %1277 = vmatpush3.msra.mxu0 (!%p1642_p10), %v434_v0  ;;  %1303 = vmatpush3.msra.mxu1 (!%p1642_p10), %v434_v0  ;;  %v429_v13 = vld [vmem:[%s1611_s21 + $0x58] sm:$0xff] (!%p1642_p10)  ;;  %v634_v14 = vld [vmem:[%s1635_s3 + $0x28] sm:$0xff] (!%p1642_p10)  ;;  %v633_v15 = vld [vmem:[%s1635_s3 + $0x20] sm:$0xff] (!%p1642_p10) }
  0x62   : > { %1278 = vmatprep.mubr.msk.f32.mxu0 (!%p1642_p10), %vm435_vm0, %v418_v4  ;;  %1290 = vmatprep.mubr.msk.f32.mxu1 (!%p1642_p10), %vm435_vm0, %v426_v5  ;;  %v422_v16 = vld [vmem:[%s1611_s21 + $0x20] sm:$0xff] (!%p1642_p10)  ;;  %v423_v18 = vld [vmem:[%s1611_s21 + $0x28] sm:$0xff] (!%p1642_p10)  ;;  %v636_v20 = vld [vmem:[%s1635_s3 + $0x38] sm:$0xff] (!%p1642_p10) }
  0x63   : > { %1279 = vmatmul.mubr.msk.f32.vlgmr.msra.gmra.mrb[0].mxu0 (!%p1642_p10), %vm435_vm0, %v419_v6  ;;  %1291 = vmatmul.mubr.msk.f32.vlgmr.msra.gmra.mrb[0].mxu1 (!%p1642_p10), %vm435_vm0, %v427_v7  ;;  %v430_v17 = vld [vmem:[%s1611_s21 + $0x60] sm:$0xff] (!%p1642_p10)  ;;  %v431_v19 = vld [vmem:[%s1611_s21 + $0x68] sm:$0xff] (!%p1642_p10)  ;;  %v635_v21 = vld [vmem:[%s1635_s3 + $0x30] sm:$0xff] (!%p1642_p10) }
  0x64   : > { %663 = vperm.xlu1 (!%p1642_p10), %1352, %v632_v8   ;;  %653 = vperm.xlu0 (!%p1642_p10), %1351, %v630_v9   ;;  %v424_v22 = vld [vmem:[%s1611_s21 + $0x30] sm:$0xff] (!%p1642_p10)  ;;  %v425_v24 = vld [vmem:[%s1611_s21 + $0x38] sm:$0xff] (!%p1642_p10)  ;;  %v638_v26 = vld [vmem:[%s1635_s3 + $0x48] sm:$0xff] (!%p1642_p10) }
  0x65   : > { %1281 = vmatprep.mubr.msk.f32.mxu0 %vm435_vm0, %v420_v10  ;;  %1293 = vmatprep.mubr.msk.f32.mxu1 %vm435_vm0, %v428_v11  ;;  %v432_v23 = vld [vmem:[%s1611_s21 + $0x70] sm:$0xff]  ;;  %v433_v25 = vld [vmem:[%s1611_s21 + $0x78] sm:$0xff]  ;;  %v637_v27 = vld [vmem:[%s1635_s3 + $0x40] sm:$0xff]  ;;  %s2146_s21 = scalar_lea.vmem %s2117_s7, %s2184_s24 }
  0x66   : > { %v640_v28 = vld [vmem:[%s1635_s3 + $0x58] sm:$0xff]  ;;  %v639_v29 = vld [vmem:[%s1635_s3 + $0x50] sm:$0xff]  ;;  %v642_v30 = vld [vmem:[%s1635_s3 + $0x68] sm:$0xff] }
  0x67   : > { %1282 = vmatmul.mubr.msk.f32.gmra.mrb[2].mxu0 %vm435_vm0, %v421_v12  ;;  %1294 = vmatmul.mubr.msk.f32.gmra.mrb[2].mxu1 %vm435_vm0, %v429_v13  ;;  %v641_v31 = vld [vmem:[%s1635_s3 + $0x60] sm:$0xff]  ;;  %v644_v32 = vld [vmem:[%s1635_s3 + $0x78] sm:$0xff]  ;;  %v643_v33 = vld [vmem:[%s1635_s3 + $0x70] sm:$0xff] }
  0x68   : > { %673 = vperm.xlu1 %1352, %v634_v14   ;;  %668 = vperm.xlu0 %1351, %v633_v15   ;;  %v877_v34 = vld [vmem:[%s1621_s16 + $0x8] sm:$0xff]  ;;  %v876_v35 = vld [vmem:[%s1621_s16] sm:$0xff]  ;;  %v879_v36 = vld [vmem:[%s1621_s16 + $0x18] sm:$0xff] }
  0x69   : > { %1284 = vmatprep.mubr.msk.f32.mxu0 %vm435_vm0, %v422_v16  ;;  %1296 = vmatprep.mubr.msk.f32.mxu1 %vm435_vm0, %v430_v17  ;;  %v878_v37 = vld [vmem:[%s1621_s16 + $0x10] sm:$0xff]  ;;  %v881_v38 = vld [vmem:[%s1621_s16 + $0x28] sm:$0xff]  ;;  %v880_v39 = vld [vmem:[%s1621_s16 + $0x20] sm:$0xff] }
  0x6a   : > { %v883_v40 = vld [vmem:[%s1621_s16 + $0x38] sm:$0xff]  ;;  %v882_v41 = vld [vmem:[%s1621_s16 + $0x30] sm:$0xff]  ;;  %v885_v42 = vld [vmem:[%s1621_s16 + $0x48] sm:$0xff] }
  0x6b   : > { %1285 = vmatmul.mubr.msk.f32.gmra.mrb[4].mxu0 %vm435_vm0, %v423_v18  ;;  %1297 = vmatmul.mubr.msk.f32.gmra.mrb[4].mxu1 %vm435_vm0, %v431_v19  ;;  %v884_v43 = vld [vmem:[%s1621_s16 + $0x40] sm:$0xff]  ;;  %v887_v44 = vld [vmem:[%s1621_s16 + $0x58] sm:$0xff]  ;;  %v886_v45 = vld [vmem:[%s1621_s16 + $0x50] sm:$0xff] }
  0x6c   : > { %683 = vperm.xlu1 %1352, %v636_v20   ;;  %678 = vperm.xlu0 %1351, %v635_v21   ;;  %v889_v46 = vld [vmem:[%s1621_s16 + $0x68] sm:$0xff]  ;;  %v888_v47 = vld [vmem:[%s1621_s16 + $0x60] sm:$0xff]  ;;  %v891_v48 = vld [vmem:[%s1621_s16 + $0x78] sm:$0xff] }
  0x6d   : > { %1287 = vmatprep.mubr.msk.f32.mxu0 %vm435_vm0, %v424_v22  ;;  %1299 = vmatprep.mubr.msk.f32.mxu1 %vm435_vm0, %v432_v23  ;;  %v890_v49 = vld [vmem:[%s1621_s16 + $0x70] sm:$0xff]  ;;  %v1724_v2 = vld [vmem:[%s2146_s21] ss:$0 sm:$0xff] }
  0x6e   : > { %v1249_v20 = vld [vmem:[%s403_s14] ss:$0 sm:$0xff] }
  0x6f   : > { %1288 = vmatmul.mubr.msk.f32.gmra.mrb[6].mxu0 %vm435_vm0, %v425_v24  ;;  %1300 = vmatmul.mubr.msk.f32.gmra.mrb[6].mxu1 %vm435_vm0, %v433_v25 }
  0x70   : > { %693 = vperm.xlu1 %1352, %v638_v26   ;;  %688 = vperm.xlu0 %1351, %v637_v27  }
  0x74   : > { %703 = vperm.xlu1 %1352, %v640_v28   ;;  %698 = vperm.xlu0 %1351, %v639_v29  }
  0x78   : > { %713 = vperm.xlu1 %1352, %v642_v30   ;;  %708 = vperm.xlu0 %1351, %v641_v31  }
  0x7c   : > { %723 = vperm.xlu1 %1352, %v644_v32   ;;  %718 = vperm.xlu0 %1351, %v643_v33  }
  0x80   : > { %897 = vperm.xlu1 %1352, %v877_v34   ;;  %894 = vperm.xlu0 %1351, %v876_v35  }
  0x84   : > { %903 = vperm.xlu1 %1352, %v879_v36   ;;  %900 = vperm.xlu0 %1351, %v878_v37  }
  0x88   : > { %909 = vperm.xlu1 %1352, %v881_v38   ;;  %906 = vperm.xlu0 %1351, %v880_v39  }
  0x8c   : > { %915 = vperm.xlu1 %1352, %v883_v40   ;;  %912 = vperm.xlu0 %1351, %v882_v41  }
  0x90   : > { %921 = vperm.xlu1 %1352, %v885_v42   ;;  %918 = vperm.xlu0 %1351, %v884_v43  }
  0x94   : > { %927 = vperm.xlu1 %1352, %v887_v44   ;;  %924 = vperm.xlu0 %1351, %v886_v45  }
  0x98   : > { %933 = vperm.xlu1 %1352, %v889_v46   ;;  %930 = vperm.xlu0 %1351, %v888_v47  }
  0x9c   : > { %939 = vperm.xlu1 %1352, %v891_v48   ;;  %936 = vperm.xlu0 %1351, %v890_v49  }
  0xdf   : > { %v659_v50 = vpop.permute.xlu1 %658  ;;  %v649_v51 = vpop.permute.xlu0 %648 }
  0xe0   : > { %v1795_v21 = vadd.f32 %v1249_v20, %v659_v50  ;;  %v732_v22 = vadd.f32 %v1249_v20, %v649_v51 }
  0xe3   : > { %v664_v52 = vpop.permute.xlu1 %663  ;;  %v654_v53 = vpop.permute.xlu0 %653 }
  0xe4   : > { %v735_v23 = vadd.f32 %v1249_v20, %v664_v52  ;;  %v733_v24 = vadd.f32 %v1249_v20, %v654_v53 }
  0xe7   : > { %v674_v54 = vpop.permute.xlu1 %673  ;;  %v669_v55 = vpop.permute.xlu0 %668 }
  0xe8   : > { %v1797_v25 = vadd.f32 %v1249_v20, %v674_v54  ;;  %v1799_v26 = vadd.f32 %v1249_v20, %v669_v55 }
  0xeb   : > { %v684_v56 = vpop.permute.xlu1 %683  ;;  %v679_v57 = vpop.permute.xlu0 %678 }
  0xec   : > { %v1801_v27 = vadd.f32 %v1249_v20, %v684_v56  ;;  %v1803_v30 = vadd.f32 %v1249_v20, %v679_v57 }
  0xef   : > { %v694_v58 = vpop.permute.xlu1 %693  ;;  %v689_v59 = vpop.permute.xlu0 %688 }
  0xf0   : > { %v741_v31 = vadd.f32 %v1249_v20, %v694_v58  ;;  %v740_v36 = vadd.f32 %v1249_v20, %v689_v59 }
  0xf3   : > { %v704_v60 = vpop.permute.xlu1 %703  ;;  %v699_v61 = vpop.permute.xlu0 %698 }
  0xf4   : > { %v743_v37 = vadd.f32 %v1249_v20, %v704_v60  ;;  %v742_v40 = vadd.f32 %v1249_v20, %v699_v61 }
  0xf7   : > { %v714_v62 = vpop.permute.xlu1 %713  ;;  %v709_v63 = vpop.permute.xlu0 %708 }
  0xf8   : > { %v1805_v41 = vadd.f32 %v1249_v20, %v714_v62  ;;  %v1807_v44 = vadd.f32 %v1249_v20, %v709_v63 }
  0xfb   : > { %v724_v0 = vpop.permute.xlu1 %723  ;;  %v1717_v1 = vpop.permute.xlu0 %718 }
  0xfc   : > { %v1809_v45 = vadd.f32 %v1249_v20, %v724_v0  ;;  %v1812_v52 = vadd.f32 %v1249_v20, %v1717_v1 }
  0xff   : > { %v1726_v4 = vpop.permute.xlu1 %897  ;;  %v1728_v5 = vpop.permute.xlu0 %894 }
 0x100   : > { %vm2130_vm1 = vcmp.eq.s32.totalorder %v1726_v4, %v1724_v2  ;;  %vm945_vm2 = vcmp.eq.s32.totalorder %v1728_v5, %v1724_v2 }
 0x103   : > { %v1734_v6 = vpop.permute.xlu1 %903  ;;  %v1736_v7 = vpop.permute.xlu0 %900 }
 0x104   : > { %vm948_vm3 = vcmp.eq.s32.totalorder %v1734_v6, %v1724_v2  ;;  %vm947_vm4 = vcmp.eq.s32.totalorder %v1736_v7, %v1724_v2 }
 0x107   : > { %v1742_v8 = vpop.permute.xlu1 %909  ;;  %v1744_v9 = vpop.permute.xlu0 %906 }
 0x108   : > { %vm2133_vm5 = vcmp.eq.s32.totalorder %v1742_v8, %v1724_v2  ;;  %vm949_vm6 = vcmp.eq.s32.totalorder %v1744_v9, %v1724_v2 }
 0x10b   : > { %v1750_v10 = vpop.permute.xlu1 %915  ;;  %v1752_v11 = vpop.permute.xlu0 %912 }
 0x10c   : > { %vm2132_vm7 = vcmp.eq.s32.totalorder %v1750_v10, %v1724_v2  ;;  %vm2131_vm8 = vcmp.eq.s32.totalorder %v1752_v11, %v1724_v2 }
 0x10f   : > { %v1758_v12 = vpop.permute.xlu1 %921  ;;  %v1760_v13 = vpop.permute.xlu0 %918 }
 0x113   : > { %v1766_v14 = vpop.permute.xlu1 %927  ;;  %v1768_v15 = vpop.permute.xlu0 %924 }
 0x117   : > { %v1774_v16 = vpop.permute.xlu1 %933  ;;  %v1776_v17 = vpop.permute.xlu0 %930 }
 0x11b   : > { %v1782_v18 = vpop.permute.xlu1 %939  ;;  %v1784_v19 = vpop.permute.xlu0 %936 }
 0x136   : > { %v1280_v28 = vpop.f32.mrb[0].mxu0  ;;  %v1292_v29 = vpop.f32.mrb[0].mxu1 }
 0x137   : > { %v749_v32 = vmul.f32 2.0, %v1280_v28  ;;  %v757_v33 = vmul.f32 2.0, %v1292_v29  ;;  %v550_v34 = vpop.f32.mrb[1].mxu0  ;;  %v590_v35 = vpop.f32.mrb[1].mxu1 }
 0x138   : > { %v748_v38 = vmul.f32 2.0, %v550_v34  ;;  %v756_v39 = vmul.f32 2.0, %v590_v35 }
 0x139   : > { %v765_v42 = vsub.f32 %v733_v24, %v749_v32  ;;  %v773_v43 = vsub.f32 %v741_v31, %v757_v33 }
 0x13a   : > { %v764_v46 = vsub.f32 %v732_v22, %v748_v38  ;;  %v772_v47 = vsub.f32 %v740_v36, %v756_v39  ;;  %v1283_v48 = vpop.f32.mrb[2].mxu0  ;;  %v1295_v49 = vpop.f32.mrb[2].mxu1 }
 0x13b   : > { %vm781_vm15 = vcmp.lt.f32.partialorder %v765_v42, 4.0  ;;  %vm813_vm0 = vcmp.lt.f32.partialorder %v765_v42, 16.0  ;;  %vm789_vm13 = vcmp.lt.f32.partialorder %v773_v43, 4.0  ;;  %vm821_vm14 = vcmp.lt.f32.partialorder %v773_v43, 16.0  ;;  %v560_v50 = vpop.f32.mrb[3].mxu0  ;;  %v600_v51 = vpop.f32.mrb[3].mxu1 }
 0x13c   : > { %v797_v53 = vsel %vm781_vm15, 1, %v1471_v3  ;;  %v829_v54 = vsel %vm813_vm0, 1, %v1471_v3  ;;  %v837_v55 = vsel %vm821_vm14, 1, %v1471_v3  ;;  %vm780_vm11 = vcmp.lt.f32.partialorder %v764_v46, 4.0 }
 0x13d   : > { %v845_v56 = vmul.u32 2, %v829_v54  ;;  %v853_v57 = vmul.u32 2, %v837_v55  ;;  %vm812_vm12 = vcmp.lt.f32.partialorder %v764_v46, 16.0  ;;  %v805_v58 = vsel %vm789_vm13, 1, %v1471_v3 }
 0x13e   : > { %v796_v59 = vsel %vm780_vm11, 1, %v1471_v3  ;;  %v828_v60 = vsel %vm812_vm12, 1, %v1471_v3  ;;  %vm820_vm9 = vcmp.lt.f32.partialorder %v772_v47, 16.0  ;;  %v1286_v61 = vpop.f32.mrb[4].mxu0  ;;  %v1298_v62 = vpop.f32.mrb[4].mxu1  ;;  %vm788_vm15 = vcmp.lt.f32.partialorder %v772_v47, 4.0 }
 0x13f   : > { %v1820_v63 = vor.u32 %v845_v56, %v797_v53  ;;  %v1822_v0 = vor.u32 %v853_v57, %v805_v58  ;;  %v844_v1 = vmul.u32 2, %v828_v60  ;;  %v570_v20 = vpop.f32.mrb[5].mxu0  ;;  %v610_v22 = vpop.f32.mrb[5].mxu1  ;;  %v836_v24 = vsel %vm820_vm9, 1, %v1471_v3 }
 0x140   : > { %v751_v28 = vmul.f32 2.0, %v1283_v48  ;;  %v759_v29 = vmul.f32 2.0, %v1295_v49  ;;  %v750_v31 = vmul.f32 2.0, %v560_v50  ;;  %v852_v33 = vmul.u32 2, %v836_v24 }
 0x141   : > { %v1825_v32 = vor.u32 %v844_v1, %v796_v59  ;;  %v758_v34 = vmul.f32 2.0, %v600_v51  ;;  %v753_v35 = vmul.f32 2.0, %v1286_v61  ;;  %v804_v36 = vsel %vm788_vm15, 1, %v1471_v3 }
 0x142   : > { %v767_v38 = vsub.f32 %v735_v23, %v751_v28  ;;  %v775_v39 = vsub.f32 %v743_v37, %v759_v29  ;;  %v766_v42 = vsub.f32 %v1795_v21, %v750_v31  ;;  %v1289_v43 = vpop.f32.mrb[6].mxu0  ;;  %v1301_v46 = vpop.f32.mrb[6].mxu1  ;;  %v1829_v47 = vor.u32 %v852_v33, %v804_v36 }
 0x143   : > { %v774_v53 = vsub.f32 %v742_v40, %v758_v34  ;;  %v769_v48 = vsub.f32 %v1797_v25, %v753_v35  ;;  %v761_v49 = vmul.f32 2.0, %v1298_v62  ;;  %v580_v50 = vpop.f32.mrb[7].mxu0  ;;  %v620_v54 = vpop.f32.mrb[7].mxu1  ;;  %v752_v37 = vmul.f32 2.0, %v570_v20 }
 0x144   : > { %vm783_vm9 = vcmp.lt.f32.partialorder %v767_v38, 4.0  ;;  %vm815_vm11 = vcmp.lt.f32.partialorder %v767_v38, 16.0  ;;  %vm791_vm12 = vcmp.lt.f32.partialorder %v775_v39, 4.0  ;;  %vm823_vm13 = vcmp.lt.f32.partialorder %v775_v39, 16.0 }
 0x145   : > { %v799_v51 = vsel %vm783_vm9, 1, %v1471_v3  ;;  %v831_v23 = vsel %vm815_vm11, 1, %v1471_v3  ;;  %v839_v21 = vsel %vm823_vm13, 1, %v1471_v3  ;;  %vm782_vm14 = vcmp.lt.f32.partialorder %v766_v42, 4.0 }
 0x146   : > { %v847_v55 = vmul.u32 2, %v831_v23  ;;  %v855_v56 = vmul.u32 2, %v839_v21  ;;  %vm814_vm0 = vcmp.lt.f32.partialorder %v766_v42, 16.0  ;;  %v807_v25 = vsel %vm791_vm12, 1, %v1471_v3 }
 0x147   : > { %v830_v40 = vsel %vm814_vm0, 1, %v1471_v3  ;;  %vm790_vm15 = vcmp.lt.f32.partialorder %v774_v53, 4.0  ;;  %vm822_vm10 = vcmp.lt.f32.partialorder %v774_v53, 16.0  ;;  %v798_v59 = vsel %vm782_vm14, 1, %v1471_v3 }
 0x148   : > { %v1837_v57 = vor.u32 %v847_v55, %v799_v51  ;;  %v1839_v58 = vor.u32 %v855_v56, %v807_v25  ;;  %v846_v60 = vmul.u32 2, %v830_v40  ;;  %v838_v61 = vsel %vm822_vm10, 1, %v1471_v3 }
 0x149   : > { %vm785_vm9 = vcmp.lt.f32.partialorder %v769_v48, 4.0  ;;  %vm817_vm11 = vcmp.lt.f32.partialorder %v769_v48, 16.0  ;;  %v777_v62 = vsub.f32 %v1805_v41, %v761_v49  ;;  %v806_v20 = vsel %vm790_vm15, 1, %v1471_v3 }
 0x14a   : > { %v1844_v1 = vor.u32 %v846_v60, %v798_v59  ;;  %v854_v24 = vmul.u32 2, %v838_v61  ;;  %v833_v28 = vsel %vm817_vm11, 1, %v1471_v3  ;;  %v768_v31 = vsub.f32 %v1799_v26, %v752_v37 }
 0x14b   : > { %v849_v29 = vmul.u32 2, %v833_v28  ;;  %vm793_vm12 = vcmp.lt.f32.partialorder %v777_v62, 4.0  ;;  %vm825_vm13 = vcmp.lt.f32.partialorder %v777_v62, 16.0  ;;  %v801_v34 = vsel %vm785_vm9, 1, %v1471_v3 }
 0x14c   : > { %v1849_v33 = vor.u32 %v854_v24, %v806_v20  ;;  %v841_v35 = vsel %vm825_vm13, 1, %v1471_v3  ;;  %v760_v36 = vmul.f32 2.0, %v610_v22  ;;  %vm784_vm10 = vcmp.lt.f32.partialorder %v768_v31, 4.0 }
 0x14d   : > { %v1853_v41 = vor.u32 %v849_v29, %v801_v34  ;;  %v857_v38 = vmul.u32 2, %v841_v35  ;;  %vm816_vm14 = vcmp.lt.f32.partialorder %v768_v31, 16.0  ;;  %v809_v39 = vsel %vm793_vm12, 1, %v1471_v3 }
 0x14e   : > { %v832_v42 = vsel %vm816_vm14, 1, %v1471_v3  ;;  %v776_v53 = vsub.f32 %v1807_v44, %v760_v36  ;;  %v755_v48 = vmul.f32 2.0, %v1289_v43  ;;  %v763_v51 = vmul.f32 2.0, %v1301_v46 }
 0x14f   : > { %v1858_v26 = vor.u32 %v857_v38, %v809_v39  ;;  %v848_v49 = vmul.u32 2, %v832_v42  ;;  %v754_v23 = vmul.f32 2.0, %v580_v50  ;;  %v800_v21 = vsel %vm784_vm10, 1, %v1471_v3 }
 0x150   : > { %vm792_vm0 = vcmp.lt.f32.partialorder %v776_v53, 4.0  ;;  %vm824_vm15 = vcmp.lt.f32.partialorder %v776_v53, 16.0  ;;  %v771_v22 = vsub.f32 %v1801_v27, %v755_v48  ;;  %v779_v56 = vsub.f32 %v1809_v45, %v763_v51 }
 0x151   : > { %v1862_v37 = vor.u32 %v848_v49, %v800_v21  ;;  %v840_v55 = vsel %vm824_vm15, 1, %v1471_v3  ;;  %v762_v25 = vmul.f32 2.0, %v620_v54  ;;  %v770_v43 = vsub.f32 %v1803_v30, %v754_v23 }
 0x152   : > { %v856_v44 = vmul.u32 2, %v840_v55  ;;  %vm787_vm9 = vcmp.lt.f32.partialorder %v771_v22, 4.0  ;;  %vm819_vm11 = vcmp.lt.f32.partialorder %v771_v22, 16.0  ;;  %v808_v46 = vsel %vm792_vm0, 1, %v1471_v3 }
 0x153   : > { %v835_v50 = vsel %vm819_vm11, 1, %v1471_v3  ;;  %vm795_vm12 = vcmp.lt.f32.partialorder %v779_v56, 4.0  ;;  %vm827_vm13 = vcmp.lt.f32.partialorder %v779_v56, 16.0  ;;  %v803_v27 = vsel %vm787_vm9, 1, %v1471_v3 }
 0x154   : > { %v1869_v40 = vor.u32 %v856_v44, %v808_v46  ;;  %v851_v59 = vmul.u32 2, %v835_v50  ;;  %v843_v60 = vsel %vm827_vm13, 1, %v1471_v3  ;;  %vm786_vm10 = vcmp.lt.f32.partialorder %v770_v43, 4.0 }
 0x155   : > { %v859_v45 = vmul.u32 2, %v843_v60  ;;  %vm818_vm14 = vcmp.lt.f32.partialorder %v770_v43, 16.0  ;;  %v778_v54 = vsub.f32 %v1812_v52, %v762_v25  ;;  %v811_v30 = vsel %vm795_vm12, 1, %v1471_v3  ;;  %964 = sbr.rel (%p1251_p13) target bundleno = 370 (0x172), region = 52 }
 0x156   : > { %v1874_v61 = vor.u32 %v851_v59, %v803_v27  ;;  %v834_v62 = vsel %vm818_vm14, 1, %v1471_v3  ;;  %v802_v28 = vsel %vm786_vm10, 1, %v1471_v3  ;;  %v965_v36 = vlaneseq (!%p1251_p13) }
 0x157   : > { %v1878_v20 = vor.u32 %v859_v45, %v811_v30  ;;  %v850_v24 = vmul.u32 2, %v834_v62  ;;  %vm794_vm0 = vcmp.lt.f32.partialorder %v778_v54, 4.0  ;;  %vm826_vm15 = vcmp.lt.f32.partialorder %v778_v54, 16.0 }
 0x158   : > { %v842_v29 = vsel %vm826_vm15, 1, %v1471_v3  ;;  %v810_v52 = vsel %vm794_vm0, 1, %v1471_v3  ;;  %v966_v38 = vshrl.u32 (!%p1251_p13), %v965_v36, 7  ;;  %v1889_v39 = vand.u32 (!%p1251_p13), 127, %v965_v36 }
 0x159   : > { %v1882_v31 = vor.u32 %v850_v24, %v802_v28  ;;  %v858_v34 = vmul.u32 2, %v842_v29 }
 0x15a   : > { %v967_v42 = vadd.s32 (!%p1251_p13), 8, %v966_v38  ;;  %v968_v53 = vadd.s32 (!%p1251_p13), 16, %v966_v38  ;;  %v969_v48 = vadd.s32 (!%p1251_p13), 24, %v966_v38  ;;  %vm984_vm9 = vcmp.lt.s32.totalorder (!%p1251_p13), %v966_v38, %v1889_v39 }
 0x15b   : > { %v1885_v35 = vor.u32 %v858_v34, %v810_v52  ;;  %vm1895_vm11 = vmand (!%p1251_p13), %vm945_vm2, %vm984_vm9  ;;  %v970_v49 = vadd.s32 (!%p1251_p13), 32, %v966_v38  ;;  %v971_v51 = vadd.s32 (!%p1251_p13), 40, %v966_v38  ;;  %v972_v23 = vadd.s32 (!%p1251_p13), 48, %v966_v38 }
 0x15c   : > { %v973_v21 = vadd.s32 56, %v966_v38  ;;  %vm985_vm12 = vcmp.lt.s32.totalorder %v967_v42, %v1889_v39  ;;  %vm986_vm13 = vcmp.lt.s32.totalorder %v968_v53, %v1889_v39  ;;  %vm987_vm10 = vcmp.lt.s32.totalorder %v969_v48, %v1889_v39 }
 0x15d   : > { %v1016_v22 = vsel %vm1895_vm11, %v1825_v32, 0  ;;  %vm1001_vm14 = vmand %vm2130_vm1, %vm985_vm12  ;;  %vm988_vm0 = vcmp.lt.s32.totalorder %v970_v49, %v1889_v39  ;;  %vm989_vm15 = vcmp.lt.s32.totalorder %v971_v51, %v1889_v39  ;;  %v974_v56 = vadd.s32 64, %v966_v38 }
 0x15e   : > { %vm1002_vm9 = vmand %vm947_vm4, %vm986_vm13  ;;  %v1017_v55 = vsel %vm1001_vm14, %v1820_v63, 0  ;;  %v975_v25 = vadd.s32 72, %v966_v38  ;;  %v976_v44 = vadd.s32 80, %v966_v38  ;;  %vm990_vm12 = vcmp.lt.s32.totalorder %v972_v23, %v1889_v39 }
 0x15f   : > { %vm1003_vm11 = vmand %vm948_vm3, %vm987_vm10  ;;  %v1018_v43 = vsel %vm1002_vm9, %v1844_v1, 0  ;;  %v1032_v46 = vpack.c.b16 %v1017_v55, %v1016_v22  ;;  %vm991_vm1 = vcmp.lt.s32.totalorder %v973_v21, %v1889_v39  ;;  %v977_v27 = vadd.s32 88, %v966_v38 }
 0x160   : > { %v1019_v50 = vsel %vm1003_vm11, %v1837_v57, 0  ;;  %vm1004_vm13 = vmand %vm949_vm6, %vm988_vm0  ;;  %vm992_vm14 = vcmp.lt.s32.totalorder %v974_v56, %v1889_v39  ;;  %v978_v45 = vadd.s32 96, %v966_v38  ;;  %vm993_vm0 = vcmp.lt.s32.totalorder %v975_v25, %v1889_v39 }
 0x161   : > { %v1033_v59 = vpack.c.b16 %v1019_v50, %v1018_v43  ;;  %vm1005_vm10 = vmand %vm2133_vm5, %vm989_vm15  ;;  %v1020_v60 = vsel %vm1004_vm13, %v1862_v37, 0  ;;  %vm994_vm11 = vcmp.lt.s32.totalorder %v976_v44, %v1889_v39  ;;  %v979_v30 = vadd.s32 104, %v966_v38 }
 0x162   : > { %vm1006_vm9 = vmand %vm2131_vm8, %vm990_vm12  ;;  %v1021_v54 = vsel %vm1005_vm10, %v1853_v41, 0  ;;  %v980_v29 = vadd.s32 112, %v966_v38  ;;  %vm995_vm12 = vcmp.lt.s32.totalorder %v977_v27, %v1889_v39  ;;  %vm2149_vm13 = vcmp.eq.s32.totalorder %v1760_v13, %v1724_v2 }
 0x163   : > { %v1034_v62 = vpack.c.b8 %v1033_v59, %v1032_v46  ;;  %vm1007_vm15 = vmand %vm2132_vm7, %vm991_vm1  ;;  %v1022_v24 = vsel %vm1006_vm9, %v1882_v31, 0  ;;  %v1035_v28 = vpack.c.b16 %v1021_v54, %v1020_v60  ;;  %v981_v52 = vadd.s32 120, %v966_v38 }
 0x164   : > { %v1023_v34 = vsel %vm1007_vm15, %v1874_v61, 0  ;;  %vm1008_vm10 = vmand %vm2149_vm13, %vm992_vm14  ;;  %vm2150_vm8 = vcmp.eq.s32.totalorder %v1758_v12, %v1724_v2  ;;  %vm996_vm9 = vcmp.lt.s32.totalorder %v978_v45, %v1889_v39  ;;  %vm2151_vm15 = vcmp.eq.s32.totalorder %v1768_v15, %v1724_v2 }
 0x165   : > { %1044 = vst [vmem:[%s1647_s5] sm:$0xff] %v1034_v62  ;;  %v1036_v36 = vpack.c.b16 %v1023_v34, %v1022_v24  ;;  %vm1009_vm1 = vmand %vm2150_vm8, %vm993_vm0  ;;  %v1024_v42 = vsel %vm1008_vm10, %v1829_v47, 0  ;;  %vm997_vm14 = vcmp.lt.s32.totalorder %v979_v30, %v1889_v39  ;;  %vm2152_vm13 = vcmp.eq.s32.totalorder %v1766_v14, %v1724_v2 }
 0x166   : > { %vm1010_vm7 = vmand %vm2151_vm15, %vm994_vm11  ;;  %v1025_v53 = vsel %vm1009_vm1, %v1822_v0, 0  ;;  %vm998_vm8 = vcmp.lt.s32.totalorder %v980_v29, %v1889_v39  ;;  %vm999_vm0 = vcmp.lt.s32.totalorder %v981_v52, %v1889_v39  ;;  %vm2153_vm11 = vcmp.eq.s32.totalorder %v1776_v17, %v1724_v2 }
 0x167   : > { %v1037_v38 = vpack.c.b8 %v1036_v36, %v1035_v28  ;;  %vm1011_vm5 = vmand %vm2152_vm13, %vm995_vm12  ;;  %v1026_v48 = vsel %vm1010_vm7, %v1849_v33, 0  ;;  %v1038_v3 = vpack.c.b16 %v1025_v53, %v1024_v42  ;;  %vm2154_vm12 = vcmp.eq.s32.totalorder %v1774_v16, %v1724_v2 }
 0x168   : > { %v1027_v49 = vsel %vm1011_vm5, %v1839_v58, 0  ;;  %vm1012_vm10 = vmand %vm2153_vm11, %vm996_vm9  ;;  %vm2155_vm7 = vcmp.eq.s32.totalorder %v1784_v19, %v1724_v2  ;;  %vm2156_vm5 = vcmp.eq.s32.totalorder %v1782_v18, %v1724_v2 }
 0x169   : > { %1045 = vst [vmem:[%s1647_s5 + $0x8] sm:$0xff] %v1037_v38  ;;  %v1039_v51 = vpack.c.b16 %v1027_v49, %v1026_v48  ;;  %vm1013_vm1 = vmand %vm2154_vm12, %vm997_vm14  ;;  %v1028_v23 = vsel %vm1012_vm10, %v1869_v40, 0 }
 0x16a   : > { %vm1014_vm15 = vmand %vm2155_vm7, %vm998_vm8  ;;  %v1029_v21 = vsel %vm1013_vm1, %v1858_v26, 0 }
 0x16b   : > { %v1040_v39 = vpack.c.b8 %v1039_v51, %v1038_v3  ;;  %vm1015_vm13 = vmand %vm2156_vm5, %vm999_vm0  ;;  %v1030_v22 = vsel %vm1014_vm15, %v1885_v35, 0  ;;  %v1041_v55 = vpack.c.b16 %v1029_v21, %v1028_v23 }
 0x16c   : > { %v1031_v56 = vsel %vm1015_vm13, %v1878_v20, 0 }
 0x16d   : > { %1046 = vst [vmem:[%s1647_s5 + $0x10] sm:$0xff] %v1040_v39  ;;  %v1042_v25 = vpack.c.b16 %v1031_v56, %v1030_v22 }
 0x16f   : > { %v1043_v44 = vpack.c.b8 %v1042_v25, %v1041_v55 }
 0x171   : > { %1047 = vst [vmem:[%s1647_s5 + $0x18] sm:$0xff] %v1043_v44 }
 0x172 PF: > { %p1252_p0 = scmp.eq.s32.totalorder %s1603_s28, %s1606_s2 }
 0x173   : > { %v1052_v43 = vsel (!%p1252_p0), %vm945_vm2, %v1825_v32, 0  ;;  %vm2157_vm9 = vcmp.eq.s32.totalorder (!%p1252_p0), %v1726_v4, %v1724_v2  ;;  %v1054_v50 = vsel (!%p1252_p0), %vm947_vm4, %v1844_v1, 0  ;;  %v1055_v27 = vsel (!%p1252_p0), %vm948_vm3, %v1837_v57, 0 }
 0x174   : > { %1051 = sbr.rel (%p1252_p0) target bundleno = 386 (0x182), region = 56  ;;  %v1053_v46 = vsel (!%p1252_p0), %vm2157_vm9, %v1820_v63, 0  ;;  %v1069_v60 = vpack.c.b16 (!%p1252_p0), %v1055_v27, %v1054_v50  ;;  %v1056_v5 = vsel (!%p1252_p0), %vm949_vm6, %v1862_v37, 0  ;;  %vm2158_vm2 = vcmp.eq.s32.totalorder (!%p1252_p0), %v1742_v8, %v1724_v2 }
 0x175   : > { %v1068_v59 = vpack.c.b16 (!%p1252_p0), %v1053_v46, %v1052_v43  ;;  %v1057_v4 = vsel (!%p1252_p0), %vm2158_vm2, %v1853_v41, 0  ;;  %vm2159_vm4 = vcmp.eq.s32.totalorder (!%p1252_p0), %v1752_v11, %v1724_v2  ;;  %vm2160_vm3 = vcmp.eq.s32.totalorder (!%p1252_p0), %v1750_v10, %v1724_v2 }
 0x176   : > { %v1058_v7 = vsel (!%p1252_p0), %vm2159_vm4, %v1882_v31, 0  ;;  %v1059_v6 = vsel (!%p1252_p0), %vm2160_vm3, %v1874_v61, 0  ;;  %v1071_v63 = vpack.c.b16 (!%p1252_p0), %v1057_v4, %v1056_v5  ;;  %vm2161_vm6 = vcmp.eq.s32.totalorder (!%p1252_p0), %v1760_v13, %v1724_v2 }
 0x177   : > { %v1060_v9 = vsel (!%p1252_p0), %vm2161_vm6, %v1829_v47, 0  ;;  %v1070_v32 = vpack.c.b8 (!%p1252_p0), %v1069_v60, %v1068_v59  ;;  %v1072_v8 = vpack.c.b16 (!%p1252_p0), %v1059_v6, %v1058_v7  ;;  %vm2162_vm14 = vcmp.eq.s32.totalorder (!%p1252_p0), %v1758_v12, %v1724_v2 }
 0x178   : > { %v1061_v11 = vsel (!%p1252_p0), %vm2162_vm14, %v1822_v0, 0  ;;  %vm2163_vm8 = vcmp.eq.s32.totalorder (!%p1252_p0), %v1768_v15, %v1724_v2  ;;  %vm2164_vm0 = vcmp.eq.s32.totalorder (!%p1252_p0), %v1766_v14, %v1724_v2  ;;  %vm2165_vm11 = vcmp.eq.s32.totalorder (!%p1252_p0), %v1776_v17, %v1724_v2 }
 0x179   : > { %v1062_v10 = vsel (!%p1252_p0), %vm2163_vm8, %v1849_v33, 0  ;;  %v1063_v13 = vsel (!%p1252_p0), %vm2164_vm0, %v1839_v58, 0  ;;  %v1074_v47 = vpack.c.b16 (!%p1252_p0), %v1061_v11, %v1060_v9  ;;  %v1064_v57 = vsel (!%p1252_p0), %vm2165_vm11, %v1869_v40, 0  ;;  %1080 = vst [vmem:[%s1647_s5] sm:$0xff] (!%p1252_p0), %v1070_v32 }
 0x17a   : > { %vm2166_vm10 = vcmp.eq.s32.totalorder (!%p1252_p0), %v1774_v16, %v1724_v2  ;;  %v1073_v15 = vpack.c.b8 (!%p1252_p0), %v1072_v8, %v1071_v63  ;;  %v1075_v0 = vpack.c.b16 (!%p1252_p0), %v1063_v13, %v1062_v10  ;;  %vm2167_vm12 = vcmp.eq.s32.totalorder (!%p1252_p0), %v1784_v19, %v1724_v2 }
 0x17b   : > { %v1065_v12 = vsel %vm2166_vm10, %v1858_v26, 0  ;;  %v1066_v14 = vsel %vm2167_vm12, %v1885_v35, 0  ;;  %vm2168_vm1 = vcmp.eq.s32.totalorder %v1782_v18, %v1724_v2 }
 0x17c   : > { %v1067_v58 = vsel %vm2168_vm1, %v1878_v20, 0  ;;  %v1077_v17 = vpack.c.b16 %v1065_v12, %v1064_v57  ;;  %1081 = vst [vmem:[%s1647_s5 + $0x8] sm:$0xff] %v1073_v15  ;;  %v1076_v33 = vpack.c.b8 %v1075_v0, %v1074_v47 }
 0x17d   : > { %v1078_v1 = vpack.c.b16 %v1067_v58, %v1066_v14 }
 0x17e   : > { %1082 = vst [vmem:[%s1647_s5 + $0x10] sm:$0xff] %v1076_v33 }
 0x17f   : > { %v1079_v41 = vpack.c.b8 %v1078_v1, %v1077_v17 }
 0x181   : > { %1083 = vst [vmem:[%s1647_s5 + $0x18] sm:$0xff] %v1079_v41 }
 0x182 PF: > { %1086 = sbr.rel (!%p1642_p10) target bundleno = 393 (0x189), region = 60  ;;  %v1472_v16 = vmov (%p1642_p10), 0  }
 0x183   : > { %1087 = vst [vmem:[%s1647_s5] sm:$0xff] (%p1642_p10), %v1472_v16  ;;  %1088 = vst [vmem:[%s1647_s5 + $0x8] sm:$0xff] (%p1642_p10), %v1472_v16 }
 0x184   : > { %1089 = vst [vmem:[%s1647_s5 + $0x10] sm:$0xff] (%p1642_p10), %v1472_v16  ;;  %1090 = vst [vmem:[%s1647_s5 + $0x18] sm:$0xff] (%p1642_p10), %v1472_v16 }
 0x189 PF: > { %s1258_s26 = sshll.u32 %s1564_s13, 9  ;;  %s1105_s16 = sshll.u32 %s1647_s5, 4  ;;  %s2068_s16 = int_to_ptr.vmem [resolvable:$true] %s1105_s16 }
 0x18a   : > { %s2065_s27 = scalar_lea.hbm %s2120_s10, %s1258_s26  ;;  %s2169_s11 = sand.u32 1, %s1457_s30  }
 0x18b   : > { %s2072_s18 = scalar_lea.sflag [#allocation8], %s2169_s11  ;;  %s1401_s17 = scalar_lea.vmem %s2068_s16, 512 }
 0x18c   : > { %p1402_p1 = scmp.ne.s32.totalorder %s2068_s16, %s1401_s17  ;;  %s1473_s13 = smov [#allocation7]  }
 0x18d   : > { %s1405_s29 = sshll.u32 %s1473_s13, 4  ;;  %s1406_s29 = int_to_ptr.vmem [resolvable:$false] %s1405_s29 }
 0x18e   : > { %p1403_p2 = pnand %p1402_p1, %p1581_p11  ;;  %s1407_s25 = scalar_lea.vmem %s1406_s29, 1024 }
 0x18f   : > { %p1408_p4 = scmp.lt.s32.totalorder %s2068_s16, %s1406_s29  ;;  %p1409_p5 = scmp.lt.s32.totalorder %s1407_s25, %s1401_s17 }
 0x190   : > { %p1404_p3 = pneg %p1403_p2 }
 0x191   : > { %p1410_p6 = por %p1409_p5, %p1408_p4 }
 0x193   : > { %p1411_p7 = pnand %p1410_p6, %p1404_p3 }
 0x195   : > { %1414 = shalt.err (!%p1411_p7)
}
 0x196   : > { %s1415_s5 = scalar_lea.hbm %s2065_s27, 512  ;;  %s1419_s20 = scalar_lea.hbm %s2120_s10, 3072 }
 0x197   : > { %p1416_p8 = scmp.ne.s32.totalorder %s2065_s27, %s1415_s5  ;;  %p1420_p13 = scmp.lt.u32.totalorder %s2065_s27, %s2120_s10 }
 0x198   : > { %p1421_p0 = scmp.lt.u32.totalorder %s1419_s20, %s1415_s5  ;;  %p1423_p2 = scmp.lt.u32.totalorder %s1415_s5, %s2065_s27 }
 0x199   : > { %p1417_p9 = pnand %p1416_p8, %p1581_p11 }
 0x19a   : > { %p1422_p1 = por %p1421_p0, %p1420_p13 }
 0x19b   : > { %p1418_p10 = pneg %p1417_p9 }
 0x19c   : > { %p1424_p3 = por %p1423_p2, %p1422_p1 }
 0x19e   : > { %p1425_p4 = pnand %p1424_p3, %p1418_p10 }
 0x1a0   : > { %1428 = shalt.err (!%p1425_p4)
}
 0x1a1   : > { %s1474_s22 = smov 128   ;;  %s1475_s4 = smov 8  }
 0x1a2   : > { %1304 = dma.vmem_to_hbm [thread:$0]  (%p1581_p11), %s2068_s16, 512, %s2065_s27, %s2072_s18, %s1474_s22, %s1474_s22, %s1475_s4  }
 0x1a3 PF: > { %s2170_s15 = sld [smem:[#allocation11_spill]]  ;;  %p1310_p5 = scmp.ge.s32.totalorder %s1465_s12, 2 }
 0x1a5   : > { %p1307_p6 = pnand %p1310_p5, %p1585_p12 }
 0x1a9   : > { %s1120_s1 = sand.u32 1, %s2170_s15  }
 0x1aa   : > { %s1121_s24 = scalar_lea.sflag [#allocation8], %s1120_s1 }
 0x1ab   : > { %1448 = dma.done.wait (!%p1307_p6), %s1121_s24, 512  }
 0x1ac   : > { %1450 = vsyncadd (!%p1307_p6), %s1121_s24, 4294966784  ;;  %s2172_s12 = sld [smem:[#allocation13_spill]]  ;;  %s2173_s26 = sld [smem:[#allocation12_spill]] }
 0x1ad   : > { %s2174_s11 = sld [smem:[#allocation14_spill]]  ;;  %s2175_s3 = smov %s1457_s30 }
 0x1b2   : > { %p38_p7 = scmp.ge.s32.totalorder %s2172_s12, 8   ;;  %s2176_s30 = smov %s2173_s26 }
 0x1b4   :  { %40 = sbr.rel (!%p38_p7) target bundleno = 50 (0x32), region = 110 }
 0x1bb   :  { %1126 = vsyncpa [#allocation8], 1 }
 0x1bc   :  { %1128 = vsyncpa [#allocation8 + $0x1], 1 }

</bundles_post_ra>
